<compile_context>
chip_gen: v7x
topology: tpu7x:2x2x1
jax: 0.10.0
libtpu: 0.0.40
codegen_flags: <defaults>
</compile_context>

<pallas_src>
import math
from functools import partial

import jax
import jax.numpy as jnp
from jax.experimental import pallas as pl
from jax.experimental.pallas import tpu as pltpu

_LANE = 128
_SUBLANE = 8


def _round_up(x, m):
    return (x + m - 1) // m * m


def _pick_tile(padded, cap, base):
    """Largest multiple of `base` that divides `padded` and is <= max(cap, base)."""
    t = max(base, min(cap, padded))
    t = (t // base) * base
    while padded % t:
        t -= base
    return t


def _linear_kernel(x_ref, w_ref, b_ref, o_ref):
    # x_ref: (tm, tk), w_ref: (tk, tn), b_ref: (1, tn), o_ref: (tm, tn) f32.
    # The output block is resident across the K grid axis -> accumulate
    # directly into it (no scratch, no zero-fill, no epilogue copy).
    k = pl.program_id(2)
    part = jnp.dot(x_ref[...], w_ref[...], preferred_element_type=jnp.float32)

    @pl.when(k == 0)
    def _():
        o_ref[...] = part + b_ref[...]

    @pl.when(k > 0)
    def _():
        o_ref[...] += part


@partial(jax.jit, static_argnames=("n_out",))
def _linear_forward_padded(x, w_t, b_row, *, n_out):
    """x: (B, ...) ; w_t: (K_pad, N_pad) pre-padded/pre-transposed ; b_row: (1, N_pad)."""
    B = x.shape[0]
    K = math.prod(x.shape[1:])
    K_pad, N_pad = w_t.shape

    # == torch x.view(B, -1): row-major flatten, no transpose.
    x2d = x.reshape(B, K)
    if x2d.dtype != w_t.dtype:
        x2d = x2d.astype(w_t.dtype)

    M_pad = _round_up(B, _SUBLANE)

    # Tiles always divide the (minimally) padded sizes -> zero over-padding.
    tm = _pick_tile(M_pad, 256, _SUBLANE)
    tn = _pick_tile(N_pad, 256, _LANE)
    tk = _pick_tile(K_pad, 2048, _LANE)

    # v7x megacore: ensure >=2 blocks on a "parallel" axis when possible.
    if M_pad // tm == 1 and N_pad // tn == 1:
        if N_pad >= 2 * _LANE:
            tn = _pick_tile(N_pad, N_pad // 2, _LANE)
        elif M_pad >= 2 * _SUBLANE:
            tm = _pick_tile(M_pad, M_pad // 2, _SUBLANE)

    # Only the (small) activation is padded per call; weight/bias were padded
    # once at init. Zero padding is exact for matmul + bias.
    if (M_pad, K_pad) != (B, K):
        x2d = jnp.pad(x2d, ((0, M_pad - B), (0, K_pad - K)))

    grid = (M_pad // tm, N_pad // tn, K_pad // tk)

    itemsize = jnp.dtype(w_t.dtype).itemsize
    cost = pl.CostEstimate(
        flops=2 * M_pad * N_pad * K_pad,
        transcendentals=0,
        # grid-aware: each operand is re-streamed once per block of the other
        # output axis.
        bytes_accessed=(itemsize * M_pad * K_pad * (N_pad // tn)
                        + itemsize * K_pad * N_pad * (M_pad // tm)
                        + 4 * M_pad * N_pad
                        + 4 * N_pad),
    )

    out_padded = pl.pallas_call(
        _linear_kernel,
        out_shape=jax.ShapeDtypeStruct((M_pad, N_pad), jnp.float32),
        grid=grid,
        in_specs=[
            pl.BlockSpec((tm, tk), lambda i, j, k: (i, k)),   # x
            pl.BlockSpec((tk, tn), lambda i, j, k: (k, j)),   # W.T (pre-transposed)
            pl.BlockSpec((1, tn), lambda i, j, k: (0, j)),    # bias (K-resident)
        ],
        out_specs=pl.BlockSpec((tm, tn), lambda i, j, k: (i, j)),
        compiler_params=pltpu.CompilerParams(
            dimension_semantics=("parallel", "parallel", "arbitrary"),
            vmem_limit_bytes=32 * 1024 * 1024,
        ),
        cost_estimate=cost,
    )(x2d, w_t, b_row)

    return out_padded[:B, :n_out]


class PallasLinear:
    """out = x.view(B, -1) @ W.T + b, with W: (labels, C*H*W)."""

    def __init__(self, weight, bias, operand_dtype=None):
        N, K = int(weight.shape[0]), int(weight.shape[1])
        self.n_out = N
        k_pad = _round_up(K, _LANE)
        n_pad = _round_up(N, _LANE)
        # One-time, eager (outside jit): transpose + pad weight to (K_pad, N_pad).
        w_t = jnp.pad(weight.T, ((0, k_pad - K), (0, n_pad - N)))
        if operand_dtype is not None:
            w_t = w_t.astype(operand_dtype)   # e.g. bf16 streaming on v6e/v7x
        self.w_t = w_t
        self.b_row = jnp.pad(bias.reshape(1, N).astype(jnp.float32),
                             ((0, 0), (0, n_pad - N)))

    def __call__(self, x):
        return _linear_forward_padded(x, self.w_t, self.b_row, n_out=self.n_out)


def _make_params(key, labels, in_features):
    kw, kb = jax.random.split(key)
    bound = 1.0 / jnp.sqrt(jnp.float32(in_features))
    weight = jax.random.uniform(kw, (labels, in_features), jnp.float32,
                                minval=-bound, maxval=bound)
    bias = jax.random.uniform(kb, (labels,), jnp.float32,
                              minval=-bound, maxval=bound)
    return weight, bias


if __name__ == "__main__":
    root = jax.random.PRNGKey(0)
    k1, k2, k3, kp1, kp2, kp3 = jax.random.split(root, 6)

    # ---- shipped module config: x (B, C, H, W), labels = out_features ----
    B, C, H, W = 2, 4, 16, 16
    labels = 8
    x = jax.random.normal(k1, (B, C, H, W), dtype=jnp.float32)
    weight, bias = _make_params(kp1, labels, C * H * W)
    lin = PallasLinear(weight, bias)
    out = jax.block_until_ready(lin(x))
    ref = x.reshape(B, -1) @ weight.T + bias
    assert out.shape == (B, labels)
    assert jnp.allclose(out, ref, atol=1e-4, rtol=1e-4)

    # ---- multi-step K reduction + N padding + megacore N split ----
    B2, C2, H2, W2 = 16, 16, 16, 16        # K = 4096 -> two K grid steps (tk=2048)
    labels2 = 200                           # padded to 256 lanes -> split into 2 N blocks
    x2 = jax.random.normal(k2, (B2, C2, H2, W2), dtype=jnp.float32)
    w2, b2 = _make_params(kp2, labels2, C2 * H2 * W2)
    lin2 = PallasLinear(w2, b2)
    out2 = jax.block_until_ready(lin2(x2))
    ref2 = x2.reshape(B2, -1) @ w2.T + b2
    assert out2.shape == (B2, labels2)
    assert jnp.allclose(out2, ref2, atol=2e-3, rtol=2e-3)

    # ---- awkward shapes: K=1100 (pads only to 1152), N=300 (pads to 384) ----
    B3, C3, H3, W3 = 6, 11, 10, 10
    labels3 = 300
    x3 = jax.random.normal(k3, (B3, C3, H3, W3), dtype=jnp.float32)
    w3, b3 = _make_params(kp3, labels3, C3 * H3 * W3)
    lin3 = PallasLinear(w3, b3)
    out3 = jax.block_until_ready(lin3(x3))
    ref3 = x3.reshape(B3, -1) @ w3.T + b3
    assert out3.shape == (B3, labels3)
    assert jnp.allclose(out3, ref3, atol=2e-3, rtol=2e-3)

    print("KERNEL_OK")
</pallas_src>

<mosaic_0001>
module attributes {stable_mosaic.version = 11 : i64} {
  func.func @_linear_kernel(%arg0: i32, %arg1: i32, %arg2: i32, %arg3: memref<8x1024xf32, #tpu.memory_space<vmem>>, %arg4: memref<1024x128xf32, #tpu.memory_space<vmem>>, %arg5: memref<1x128xf32, #tpu.memory_space<vmem>>, %arg6: memref<8x128xf32, #tpu.memory_space<vmem>>) attributes {dimension_semantics = [#tpu.dimension_semantics<parallel>, #tpu.dimension_semantics<parallel>, #tpu.dimension_semantics<arbitrary>], iteration_bounds = array<i64: 1, 1, 1>, scalar_prefetch = 0 : i64, scratch_operands = 0 : i64, tpu.core_type = #tpu.core_type<tc>, window_params = [{transform_indices = @transform_0, window_bounds = array<i64: 8, 1024>}, {transform_indices = @transform_1, window_bounds = array<i64: 1024, 128>}, {transform_indices = @transform_2, window_bounds = array<i64: 1, 128>}, {transform_indices = @transform_3, window_bounds = array<i64: 8, 128>}]} {
    %c0 = arith.constant 0 : index
    %c0_0 = arith.constant 0 : index
    %0 = vector.load %arg3[%c0, %c0_0] : memref<8x1024xf32, #tpu.memory_space<vmem>>, vector<8x1024xf32>
    %c0_1 = arith.constant 0 : index
    %c0_2 = arith.constant 0 : index
    %1 = vector.load %arg4[%c0_1, %c0_2] : memref<1024x128xf32, #tpu.memory_space<vmem>>, vector<1024x128xf32>
    %cst = arith.constant dense<0.000000e+00> : vector<8x128xf32>
    %2 = tpu.matmul %0, %1, %cst {dimension_numbers = #tpu.dot_dimension_numbers<[1], [0], [0], [1], [0, 0, 1, 1], [], []>} : vector<8x1024xf32>, vector<1024x128xf32>, vector<8x128xf32> -> vector<8x128xf32>
    %c0_i32 = arith.constant 0 : i32
    %3 = arith.cmpi eq, %arg2, %c0_i32 : i32
    %4 = arith.extui %3 : i1 to i32
    %c0_i32_3 = arith.constant 0 : i32
    %5 = arith.cmpi ne, %4, %c0_i32_3 : i32
    scf.if %5 {
      %c0_6 = arith.constant 0 : index
      %c0_7 = arith.constant 0 : index
      %9 = vector.load %arg5[%c0_6, %c0_7] : memref<1x128xf32, #tpu.memory_space<vmem>>, vector<1x128xf32>
      %10 = vector.broadcast %9 : vector<1x128xf32> to vector<8x128xf32>
      %11 = arith.addf %2, %10 : vector<8x128xf32>
      %c0_8 = arith.constant 0 : index
      %c0_9 = arith.constant 0 : index
      %12 = vector.load %arg6[%c0_8, %c0_9] : memref<8x128xf32, #tpu.memory_space<vmem>>, vector<8x128xf32>
      tpu.vector_store %arg6[%c0_8, %c0_9], %11 {strides = array<i32>} : memref<8x128xf32, #tpu.memory_space<vmem>>, vector<8x128xf32>,
    } else {
    }
    %c0_i32_4 = arith.constant 0 : i32
    %6 = arith.cmpi sgt, %arg2, %c0_i32_4 : i32
    %7 = arith.extui %6 : i1 to i32
    %c0_i32_5 = arith.constant 0 : i32
    %8 = arith.cmpi ne, %7, %c0_i32_5 : i32
    scf.if %8 {
      %c0_6 = arith.constant 0 : index
      %c0_7 = arith.constant 0 : index
      %9 = vector.load %arg6[%c0_6, %c0_7] : memref<8x128xf32, #tpu.memory_space<vmem>>, vector<8x128xf32>
      %10 = arith.addf %9, %2 : vector<8x128xf32>
      %c0_8 = arith.constant 0 : index
      %c0_9 = arith.constant 0 : index
      %11 = vector.load %arg6[%c0_8, %c0_9] : memref<8x128xf32, #tpu.memory_space<vmem>>, vector<8x128xf32>
      tpu.vector_store %arg6[%c0_8, %c0_9], %10 {strides = array<i32>} : memref<8x128xf32, #tpu.memory_space<vmem>>, vector<8x128xf32>,
    } else {
    }
    return
  }
  func.func @transform_0(%arg0: i32, %arg1: i32, %arg2: i32) -> (i32, i32) {
    %c0_i32 = arith.constant 0 : i32
    return %arg0, %arg2 : i32, i32
  }
  func.func @transform_1(%arg0: i32, %arg1: i32, %arg2: i32) -> (i32, i32) {
    %c0_i32 = arith.constant 0 : i32
    return %arg2, %arg1 : i32, i32
  }
  func.func @transform_2(%arg0: i32, %arg1: i32, %arg2: i32) -> (i32, i32) {
    %c0_i32 = arith.constant 0 : i32
    %c0_i32_0 = arith.constant 0 : i32
    return %c0_i32, %arg1 : i32, i32
  }
  func.func @transform_3(%arg0: i32, %arg1: i32, %arg2: i32) -> (i32, i32) {
    %c0_i32 = arith.constant 0 : i32
    return %arg0, %arg1 : i32, i32
  }
}

</mosaic_0001>

<bundles_post_ra>
// kernel: _linear_forward_padded.1
= control target key start
LH: loop header
LB: loop body
LE: loop exit
PB: predicated region body
PF: predicated region fallthrough
CT: control target
= control target key end

     0   :  { %8 = vsyncpa [#allocation3], 0  ;;  %s765_s12 = smov [#allocation2]   ;;  %s830_s0 = inlined_call_operand.vmem [shape: f32[8,1024], index: 0, kind: input, shape index: {}]   ;;  %s831_s1 = inlined_call_operand.hbm [shape: f32[1024,128], index: 1, kind: input, shape index: {}]   ;;  %s832_s2 = inlined_call_operand.vmem [shape: f32[1,128], index: 2, kind: input, shape index: {}]   ;;  %s833_s3 = inlined_call_operand.vmem [shape: f32[8,128], index: 3, kind: output, shape index: {}]  }
   0x1   :  { %s16_s13 = sshll.u32 %s765_s12, 4  ;;  %s741_s16 = scalar_lea.hbm %s831_s1, 16384  ;;  %s17_s13 = int_to_ptr.vmem [resolvable:$true] %s16_s13 }
   0x2   :  { %p742_p0 = scmp.ne.s32.totalorder %s831_s1, %s741_s16  ;;  %p745_p1 = scmp.lt.u32.totalorder %s741_s16, %s831_s1 }
   0x4   :  { %p747_p2 = pnand %p745_p1, %p742_p0 }
   0x6   :  { %750 = shalt.err (!%p747_p2)
}
   0x7   :  { %s751_s21 = scalar_lea.vmem %s17_s13, 16384  ;;  %p756_p4 = scmp.lt.s32.totalorder %s17_s13, %s17_s13 }
   0x8   :  { %p752_p3 = scmp.ne.s32.totalorder %s17_s13, %s751_s21  ;;  %p757_p5 = scmp.lt.s32.totalorder %s751_s21, %s751_s21 }
   0xa   :  { %p758_p6 = por %p757_p5, %p756_p4 }
   0xc   :  { %p759_p7 = pnand %p758_p6, %p752_p3 }
   0xe   :  { %762 = shalt.err (!%p759_p7)
}
   0xf   :  { %s766_s22 = smov 128   ;;  %s767_s23 = smov 8  }
  0x10   :  { %22 = dma.hbm_to_vmem [thread:$0]  %s831_s1, 16384, %s17_s13, [#allocation3], %s766_s22, %s766_s22, %s767_s23  }
  0x11   :  { %763 = dma.done.wait [#allocation3], 16384  }
  0x12   :  { %764 = vsyncadd [#allocation3], 4294950912  ;;  %v52_v0 = vld [vmem:[#allocation2 + $0x80] sm:$0xff]  ;;  %v53_v1 = vld [vmem:[#allocation2 + $0x88] sm:$0xff] }
  0x13   :  { %v84_v2 = vld [vmem:[#allocation2 + $0x180] sm:$0xff]  ;;  %v610_v3 = vpack.c.bf16 %v53_v1, %v52_v0  ;;  %v85_v4 = vld [vmem:[#allocation2 + $0x188] sm:$0xff]  ;;  %v54_v11 = vld [vmem:[#allocation2 + $0x90] sm:$0xff] }
  0x14   :  { %v36_v5 = vld [vmem:[#allocation2] sm:$0xff]  ;;  %v37_v6 = vld [vmem:[#allocation2 + $0x8] sm:$0xff]  ;;  %v642_v7 = vpack.c.bf16 %v85_v4, %v84_v2  ;;  %v55_v13 = vld [vmem:[#allocation2 + $0x98] sm:$0xff] }
  0x15   :  { %v612_v8 = vpack.c.bf16 %v37_v6, %v36_v5  ;;  %v68_v9 = vld [vmem:[#allocation2 + $0x100] sm:$0xff]  ;;  %v69_v10 = vld [vmem:[#allocation2 + $0x108] sm:$0xff]  ;;  %611 = vmatprep.subr.bf16.mxu0 %v610_v3  ;;  %v86_v14 = vld [vmem:[#allocation2 + $0x190] sm:$0xff]  ;;  %v614_v16 = vpack.c.bf16 %v55_v13, %v54_v11 }
  0x16   :  { %v644_v12 = vpack.c.bf16 %v69_v10, %v68_v9  ;;  %v87_v15 = vld [vmem:[#allocation2 + $0x198] sm:$0xff]  ;;  %643 = vmatprep.subr.bf16.mxu1 %v642_v7  ;;  %v38_v18 = vld [vmem:[#allocation2 + $0x10] sm:$0xff]  ;;  %v56_v23 = vld [vmem:[#allocation2 + $0xa0] sm:$0xff] }
  0x17   :  { %613 = vmatpush3.bf16.msra.mxu0 %v612_v8  ;;  %v646_v17 = vpack.c.bf16 %v87_v15, %v86_v14  ;;  %v39_v19 = vld [vmem:[#allocation2 + $0x18] sm:$0xff]  ;;  %v70_v20 = vld [vmem:[#allocation2 + $0x110] sm:$0xff]  ;;  %v57_v24 = vld [vmem:[#allocation2 + $0xa8] sm:$0xff] }
  0x18   :  { %645 = vmatpush3.bf16.msra.mxu1 %v644_v12  ;;  %v616_v21 = vpack.c.bf16 %v39_v19, %v38_v18  ;;  %v71_v22 = vld [vmem:[#allocation2 + $0x118] sm:$0xff]  ;;  %615 = vmatprep.subr.bf16.mxu0 %v614_v16  ;;  %v618_v26 = vpack.c.bf16 %v57_v24, %v56_v23  ;;  %v88_v27 = vld [vmem:[#allocation2 + $0x1a0] sm:$0xff]  ;;  %v89_v28 = vld [vmem:[#allocation2 + $0x1a8] sm:$0xff] }
  0x19   :  { %647 = vmatprep.subr.bf16.mxu1 %v646_v17  ;;  %v648_v25 = vpack.c.bf16 %v71_v22, %v70_v20  ;;  %v40_v29 = vld [vmem:[#allocation2 + $0x20] sm:$0xff]  ;;  %v650_v30 = vpack.c.bf16 %v89_v28, %v88_v27  ;;  %v41_v31 = vld [vmem:[#allocation2 + $0x28] sm:$0xff]  ;;  %v58_v35 = vld [vmem:[#allocation2 + $0xb0] sm:$0xff] }
  0x1a   :  { %v72_v32 = vld [vmem:[#allocation2 + $0x120] sm:$0xff]  ;;  %v73_v33 = vld [vmem:[#allocation2 + $0x128] sm:$0xff]  ;;  %v620_v34 = vpack.c.bf16 %v41_v31, %v40_v29  ;;  %v59_v36 = vld [vmem:[#allocation2 + $0xb8] sm:$0xff] }
  0x1b   :  { %617 = vmatpush3.bf16.msra.mxu0 %v616_v21  ;;  %v90_v37 = vld [vmem:[#allocation2 + $0x1b0] sm:$0xff]  ;;  %v652_v38 = vpack.c.bf16 %v73_v33, %v72_v32  ;;  %v622_v39 = vpack.c.bf16 %v59_v36, %v58_v35  ;;  %v91_v40 = vld [vmem:[#allocation2 + $0x1b8] sm:$0xff]  ;;  %v60_v46 = vld [vmem:[#allocation2 + $0xc0] sm:$0xff] }
  0x1c   :  { %649 = vmatpush3.bf16.msra.mxu1 %v648_v25  ;;  %619 = vmatprep.subr.bf16.mxu0 %v618_v26  ;;  %v42_v41 = vld [vmem:[#allocation2 + $0x30] sm:$0xff]  ;;  %v43_v42 = vld [vmem:[#allocation2 + $0x38] sm:$0xff]  ;;  %v654_v43 = vpack.c.bf16 %v91_v40, %v90_v37  ;;  %v61_v47 = vld [vmem:[#allocation2 + $0xc8] sm:$0xff] }
  0x1d   :  { %651 = vmatprep.subr.bf16.mxu1 %v650_v30  ;;  %v74_v44 = vld [vmem:[#allocation2 + $0x130] sm:$0xff]  ;;  %v75_v45 = vld [vmem:[#allocation2 + $0x138] sm:$0xff]  ;;  %v92_v48 = vld [vmem:[#allocation2 + $0x1c0] sm:$0xff]  ;;  %v624_v50 = vpack.c.bf16 %v43_v42, %v42_v41  ;;  %v626_v52 = vpack.c.bf16 %v61_v47, %v60_v46 }
  0x1e   :  { %v93_v49 = vld [vmem:[#allocation2 + $0x1c8] sm:$0xff]  ;;  %v656_v51 = vpack.c.bf16 %v75_v45, %v74_v44  ;;  %v44_v53 = vld [vmem:[#allocation2 + $0x40] sm:$0xff]  ;;  %v62_v58 = vld [vmem:[#allocation2 + $0xd0] sm:$0xff] }
  0x1f   :  { %621 = vmatpush3.bf16.msra.mxu0 %v620_v34  ;;  %v45_v54 = vld [vmem:[#allocation2 + $0x48] sm:$0xff]  ;;  %v76_v55 = vld [vmem:[#allocation2 + $0x140] sm:$0xff]  ;;  %v658_v56 = vpack.c.bf16 %v93_v49, %v92_v48  ;;  %v63_v59 = vld [vmem:[#allocation2 + $0xd8] sm:$0xff] }
  0x20   :  { %653 = vmatpush3.bf16.msra.mxu1 %v652_v38  ;;  %623 = vmatprep.subr.bf16.mxu0 %v622_v39  ;;  %v77_v57 = vld [vmem:[#allocation2 + $0x148] sm:$0xff]  ;;  %v94_v60 = vld [vmem:[#allocation2 + $0x1d0] sm:$0xff]  ;;  %v95_v61 = vld [vmem:[#allocation2 + $0x1d8] sm:$0xff]  ;;  %v628_v62 = vpack.c.bf16 %v45_v54, %v44_v53  ;;  %v630_v0 = vpack.c.bf16 %v63_v59, %v62_v58 }
  0x21   :  { %655 = vmatprep.subr.bf16.mxu1 %v654_v43  ;;  %v660_v63 = vpack.c.bf16 %v77_v57, %v76_v55  ;;  %v46_v1 = vld [vmem:[#allocation2 + $0x50] sm:$0xff]  ;;  %v47_v2 = vld [vmem:[#allocation2 + $0x58] sm:$0xff]  ;;  %v662_v4 = vpack.c.bf16 %v95_v61, %v94_v60  ;;  %v64_v6 = vld [vmem:[#allocation2 + $0xe0] sm:$0xff] }
  0x22   :  { %v78_v3 = vld [vmem:[#allocation2 + $0x150] sm:$0xff]  ;;  %v79_v5 = vld [vmem:[#allocation2 + $0x158] sm:$0xff]  ;;  %v65_v7 = vld [vmem:[#allocation2 + $0xe8] sm:$0xff]  ;;  %v632_v10 = vpack.c.bf16 %v47_v2, %v46_v1 }
  0x23   :  { %625 = vmatpush3.bf16.msra.mxu0 %v624_v50  ;;  %v96_v8 = vld [vmem:[#allocation2 + $0x1e0] sm:$0xff]  ;;  %v97_v9 = vld [vmem:[#allocation2 + $0x1e8] sm:$0xff]  ;;  %v664_v13 = vpack.c.bf16 %v79_v5, %v78_v3  ;;  %v634_v14 = vpack.c.bf16 %v65_v7, %v64_v6  ;;  %v31_v17 = vld [vmem:[%s830_s0 + $0x18] sm:$0xff] }
  0x24   :  { %657 = vmatpush3.bf16.msra.mxu1 %v656_v51  ;;  %627 = vmatprep.subr.bf16.mxu0 %v626_v52  ;;  %v48_v11 = vld [vmem:[#allocation2 + $0x60] sm:$0xff]  ;;  %v49_v12 = vld [vmem:[#allocation2 + $0x68] sm:$0xff]  ;;  %v666_v18 = vpack.c.bf16 %v97_v9, %v96_v8  ;;  %v66_v20 = vld [vmem:[#allocation2 + $0xf0] sm:$0xff] }
  0x25   :  { %659 = vmatprep.subr.bf16.mxu1 %v658_v56  ;;  %v80_v15 = vld [vmem:[#allocation2 + $0x160] sm:$0xff]  ;;  %v29_v16 = vld [vmem:[%s830_s0 + $0x8] sm:$0xff]  ;;  %v67_v21 = vld [vmem:[#allocation2 + $0xf8] sm:$0xff]  ;;  %298 = vmatprep.mubr.f32.mxu1 %v31_v17  ;;  %v636_v24 = vpack.c.bf16 %v49_v12, %v48_v11 }
  0x26   :  { %v81_v19 = vld [vmem:[#allocation2 + $0x168] sm:$0xff]  ;;  %228 = vmatprep.mubr.f32.mxu0 %v29_v16  ;;  %v98_v22 = vld [vmem:[#allocation2 + $0x1f0] sm:$0xff]  ;;  %v99_v23 = vld [vmem:[#allocation2 + $0x1f8] sm:$0xff]  ;;  %v638_v26 = vpack.c.bf16 %v67_v21, %v66_v20 }
  0x27   :  { %629 = vmatpush3.bf16.msra.mxu0 %v628_v62  ;;  %v668_v25 = vpack.c.bf16 %v81_v19, %v80_v15  ;;  %v50_v27 = vld [vmem:[#allocation2 + $0x70] sm:$0xff]  ;;  %v51_v28 = vld [vmem:[#allocation2 + $0x78] sm:$0xff]  ;;  %v670_v30 = vpack.c.bf16 %v99_v23, %v98_v22  ;;  %v116_v32 = vld [vmem:[#allocation2 + $0x280] sm:$0xff] }
  0x28   :  { %661 = vmatpush3.bf16.msra.mxu1 %v660_v63  ;;  %631 = vmatprep.subr.bf16.mxu0 %v630_v0  ;;  %v82_v29 = vld [vmem:[#allocation2 + $0x170] sm:$0xff]  ;;  %v83_v31 = vld [vmem:[#allocation2 + $0x178] sm:$0xff]  ;;  %v117_v33 = vld [vmem:[#allocation2 + $0x288] sm:$0xff]  ;;  %v640_v36 = vpack.c.bf16 %v51_v28, %v50_v27 }
  0x29   :  { %663 = vmatprep.subr.bf16.mxu1 %v662_v4  ;;  %v148_v34 = vld [vmem:[#allocation2 + $0x380] sm:$0xff]  ;;  %v149_v35 = vld [vmem:[#allocation2 + $0x388] sm:$0xff]  ;;  %v672_v37 = vpack.c.bf16 %v83_v31, %v82_v29  ;;  %v674_v38 = vpack.c.bf16 %v117_v33, %v116_v32  ;;  %v118_v44 = vld [vmem:[#allocation2 + $0x290] sm:$0xff] }
  0x2a   :  { %v100_v39 = vld [vmem:[#allocation2 + $0x200] sm:$0xff]  ;;  %v101_v40 = vld [vmem:[#allocation2 + $0x208] sm:$0xff]  ;;  %v706_v42 = vpack.c.bf16 %v149_v35, %v148_v34  ;;  %v119_v45 = vld [vmem:[#allocation2 + $0x298] sm:$0xff] }
  0x2b   :  { %633 = vmatpush3.bf16.msra.mxu0 %v632_v10  ;;  %v132_v41 = vld [vmem:[#allocation2 + $0x300] sm:$0xff]  ;;  %v133_v43 = vld [vmem:[#allocation2 + $0x308] sm:$0xff]  ;;  %v150_v46 = vld [vmem:[#allocation2 + $0x390] sm:$0xff]  ;;  %v676_v50 = vpack.c.bf16 %v101_v40, %v100_v39  ;;  %v678_v52 = vpack.c.bf16 %v119_v45, %v118_v44 }
  0x2c   :  { %665 = vmatpush3.bf16.msra.mxu1 %v664_v13  ;;  %635 = vmatprep.subr.bf16.mxu0 %v634_v14  ;;  %v151_v47 = vld [vmem:[#allocation2 + $0x398] sm:$0xff]  ;;  %v28_v48 = vld [vmem:[%s830_s0] sm:$0xff]  ;;  %v30_v49 = vld [vmem:[%s830_s0 + $0x10] sm:$0xff]  ;;  %v708_v51 = vpack.c.bf16 %v133_v43, %v132_v41 }
  0x2d   :  { %667 = vmatprep.subr.bf16.mxu1 %v666_v18  ;;  %v102_v53 = vld [vmem:[#allocation2 + $0x210] sm:$0xff]  ;;  %v103_v54 = vld [vmem:[#allocation2 + $0x218] sm:$0xff]  ;;  %v710_v56 = vpack.c.bf16 %v151_v47, %v150_v46  ;;  %v120_v58 = vld [vmem:[#allocation2 + $0x2a0] sm:$0xff] }
  0x2e   :  { %v134_v55 = vld [vmem:[#allocation2 + $0x310] sm:$0xff]  ;;  %v135_v57 = vld [vmem:[#allocation2 + $0x318] sm:$0xff]  ;;  %v121_v59 = vld [vmem:[#allocation2 + $0x2a8] sm:$0xff]  ;;  %v680_v62 = vpack.c.bf16 %v103_v54, %v102_v53 }
  0x2f   :  { %637 = vmatpush3.bf16.msra.mxu0 %v636_v24  ;;  %v152_v60 = vld [vmem:[#allocation2 + $0x3a0] sm:$0xff]  ;;  %v153_v61 = vld [vmem:[#allocation2 + $0x3a8] sm:$0xff]  ;;  %v712_v63 = vpack.c.bf16 %v135_v57, %v134_v55  ;;  %v682_v0 = vpack.c.bf16 %v121_v59, %v120_v58  ;;  %v122_v6 = vld [vmem:[#allocation2 + $0x2b0] sm:$0xff] }
  0x30   :  { %669 = vmatpush3.bf16.msra.mxu1 %v668_v25  ;;  %639 = vmatprep.subr.bf16.mxu0 %v638_v26  ;;  %v104_v1 = vld [vmem:[#allocation2 + $0x220] sm:$0xff]  ;;  %v105_v2 = vld [vmem:[#allocation2 + $0x228] sm:$0xff]  ;;  %v714_v4 = vpack.c.bf16 %v153_v61, %v152_v60  ;;  %v123_v7 = vld [vmem:[#allocation2 + $0x2b8] sm:$0xff] }
  0x31   :  { %671 = vmatprep.subr.bf16.mxu1 %v670_v30  ;;  %v136_v3 = vld [vmem:[#allocation2 + $0x320] sm:$0xff]  ;;  %v137_v5 = vld [vmem:[#allocation2 + $0x328] sm:$0xff]  ;;  %v154_v8 = vld [vmem:[#allocation2 + $0x3b0] sm:$0xff]  ;;  %v684_v10 = vpack.c.bf16 %v105_v2, %v104_v1  ;;  %v686_v12 = vpack.c.bf16 %v123_v7, %v122_v6 }
  0x32   :  { %v155_v9 = vld [vmem:[#allocation2 + $0x3b8] sm:$0xff]  ;;  %v716_v11 = vpack.c.bf16 %v137_v5, %v136_v3  ;;  %v106_v13 = vld [vmem:[#allocation2 + $0x230] sm:$0xff]  ;;  %v124_v18 = vld [vmem:[#allocation2 + $0x2c0] sm:$0xff] }
  0x33   :  { %641 = vmatpush3.bf16.msra.mxu0 %v640_v36  ;;  %v107_v14 = vld [vmem:[#allocation2 + $0x238] sm:$0xff]  ;;  %v138_v15 = vld [vmem:[#allocation2 + $0x330] sm:$0xff]  ;;  %v718_v16 = vpack.c.bf16 %v155_v9, %v154_v8  ;;  %v125_v19 = vld [vmem:[#allocation2 + $0x2c8] sm:$0xff] }
  0x34   :  { %673 = vmatpush3.bf16.msra.mxu1 %v672_v37  ;;  %675 = vmatprep.subr.bf16.mxu0 %v674_v38  ;;  %v139_v17 = vld [vmem:[#allocation2 + $0x338] sm:$0xff]  ;;  %v156_v20 = vld [vmem:[#allocation2 + $0x3c0] sm:$0xff]  ;;  %v157_v21 = vld [vmem:[#allocation2 + $0x3c8] sm:$0xff]  ;;  %v688_v22 = vpack.c.bf16 %v107_v14, %v106_v13  ;;  %v690_v26 = vpack.c.bf16 %v125_v19, %v124_v18 }
  0x35   :  { %707 = vmatprep.subr.bf16.mxu1 %v706_v42  ;;  %v33_v23 = vld [vmem:[%s830_s0 + $0x28] sm:$0xff]  ;;  %v35_v24 = vld [vmem:[%s830_s0 + $0x38] sm:$0xff]  ;;  %v720_v25 = vpack.c.bf16 %v139_v17, %v138_v15  ;;  %v108_v27 = vld [vmem:[#allocation2 + $0x240] sm:$0xff]  ;;  %v722_v30 = vpack.c.bf16 %v157_v21, %v156_v20 }
  0x36   :  { %229 = vmatmul.mubr.f32.vlgmr.msra.gmra.mrb[0].mxu0 %v28_v48  ;;  %v109_v28 = vld [vmem:[#allocation2 + $0x248] sm:$0xff]  ;;  %v140_v29 = vld [vmem:[#allocation2 + $0x340] sm:$0xff]  ;;  %v126_v32 = vld [vmem:[#allocation2 + $0x2d0] sm:$0xff] }
  0x37   :  { %299 = vmatmul.mubr.f32.vlgmr.msra.gmra.mrb[0].mxu1 %v30_v49  ;;  %677 = vmatpush3.bf16.msra.mxu0 %v676_v50  ;;  %v141_v31 = vld [vmem:[#allocation2 + $0x348] sm:$0xff]  ;;  %v127_v33 = vld [vmem:[#allocation2 + $0x2d8] sm:$0xff]  ;;  %v158_v34 = vld [vmem:[#allocation2 + $0x3d0] sm:$0xff]  ;;  %v692_v36 = vpack.c.bf16 %v109_v28, %v108_v27 }
  0x38   :  { %709 = vmatpush3.bf16.msra.mxu1 %v708_v51  ;;  %679 = vmatprep.subr.bf16.mxu0 %v678_v52  ;;  %v159_v35 = vld [vmem:[#allocation2 + $0x3d8] sm:$0xff]  ;;  %v724_v37 = vpack.c.bf16 %v141_v31, %v140_v29  ;;  %v694_v38 = vpack.c.bf16 %v127_v33, %v126_v32  ;;  %v110_v39 = vld [vmem:[#allocation2 + $0x250] sm:$0xff]  ;;  %v128_v44 = vld [vmem:[#allocation2 + $0x2e0] sm:$0xff] }
  0x39   :  { %711 = vmatprep.subr.bf16.mxu1 %v710_v56  ;;  %368 = vmatprep.mubr.f32.mxu0 %v33_v23  ;;  %v111_v40 = vld [vmem:[#allocation2 + $0x258] sm:$0xff]  ;;  %v142_v41 = vld [vmem:[#allocation2 + $0x350] sm:$0xff]  ;;  %v726_v42 = vpack.c.bf16 %v159_v35, %v158_v34  ;;  %v129_v45 = vld [vmem:[#allocation2 + $0x2e8] sm:$0xff] }
  0x3a   :  { %438 = vmatprep.mubr.f32.mxu1 %v35_v24  ;;  %v143_v43 = vld [vmem:[#allocation2 + $0x358] sm:$0xff]  ;;  %v160_v46 = vld [vmem:[#allocation2 + $0x3e0] sm:$0xff]  ;;  %v161_v47 = vld [vmem:[#allocation2 + $0x3e8] sm:$0xff]  ;;  %v696_v48 = vpack.c.bf16 %v111_v40, %v110_v39  ;;  %v698_v50 = vpack.c.bf16 %v129_v45, %v128_v44 }
  0x3b   :  { %681 = vmatpush3.bf16.msra.mxu0 %v680_v62  ;;  %v728_v49 = vpack.c.bf16 %v143_v43, %v142_v41  ;;  %v112_v51 = vld [vmem:[#allocation2 + $0x260] sm:$0xff]  ;;  %v113_v52 = vld [vmem:[#allocation2 + $0x268] sm:$0xff]  ;;  %v730_v54 = vpack.c.bf16 %v161_v47, %v160_v46  ;;  %v130_v56 = vld [vmem:[#allocation2 + $0x2f0] sm:$0xff] }
  0x3c   :  { %713 = vmatpush3.bf16.msra.mxu1 %v712_v63  ;;  %683 = vmatprep.subr.bf16.mxu0 %v682_v0  ;;  %v144_v53 = vld [vmem:[#allocation2 + $0x360] sm:$0xff]  ;;  %v145_v55 = vld [vmem:[#allocation2 + $0x368] sm:$0xff]  ;;  %v131_v57 = vld [vmem:[#allocation2 + $0x2f8] sm:$0xff]  ;;  %v700_v60 = vpack.c.bf16 %v113_v52, %v112_v51 }
  0x3d   :  { %715 = vmatprep.subr.bf16.mxu1 %v714_v4  ;;  %v162_v58 = vld [vmem:[#allocation2 + $0x3f0] sm:$0xff]  ;;  %v163_v59 = vld [vmem:[#allocation2 + $0x3f8] sm:$0xff]  ;;  %v732_v61 = vpack.c.bf16 %v145_v55, %v144_v53  ;;  %v702_v62 = vpack.c.bf16 %v131_v57, %v130_v56  ;;  %v32_v6 = vld [vmem:[%s830_s0 + $0x20] sm:$0xff] }
  0x3e   :  { %v114_v63 = vld [vmem:[#allocation2 + $0x270] sm:$0xff]  ;;  %v115_v0 = vld [vmem:[#allocation2 + $0x278] sm:$0xff]  ;;  %v734_v1 = vpack.c.bf16 %v163_v59, %v162_v58 }
  0x3f   :  { %685 = vmatpush3.bf16.msra.mxu0 %v684_v10  ;;  %v146_v2 = vld [vmem:[#allocation2 + $0x370] sm:$0xff]  ;;  %v147_v3 = vld [vmem:[#allocation2 + $0x378] sm:$0xff]  ;;  %v704_v4 = vpack.c.bf16 %v115_v0, %v114_v63 }
  0x40   :  { %717 = vmatpush3.bf16.msra.mxu1 %v716_v11  ;;  %687 = vmatprep.subr.bf16.mxu0 %v686_v12  ;;  %v736_v5 = vpack.c.bf16 %v147_v3, %v146_v2  ;;  %v34_v7 = vld [vmem:[%s830_s0 + $0x30] sm:$0xff] }
  0x41   :  { %719 = vmatprep.subr.bf16.mxu1 %v718_v16 }
  0x43   :  { %689 = vmatpush3.bf16.msra.mxu0 %v688_v22  ;;  %v469_v22 = vld [vmem:[%s832_s2] ss:$0 sm:$0xff] }
  0x44   :  { %721 = vmatpush3.bf16.msra.mxu1 %v720_v25  ;;  %691 = vmatprep.subr.bf16.mxu0 %v690_v26 }
  0x45   :  { %723 = vmatprep.subr.bf16.mxu1 %v722_v30 }
  0x47   :  { %693 = vmatpush3.bf16.msra.mxu0 %v692_v36 }
  0x48   :  { %725 = vmatpush3.bf16.msra.mxu1 %v724_v37  ;;  %695 = vmatprep.subr.bf16.mxu0 %v694_v38 }
  0x49   :  { %727 = vmatprep.subr.bf16.mxu1 %v726_v42 }
  0x4b   :  { %697 = vmatpush3.bf16.msra.mxu0 %v696_v48 }
  0x4c   :  { %729 = vmatpush3.bf16.msra.mxu1 %v728_v49  ;;  %699 = vmatprep.subr.bf16.mxu0 %v698_v50 }
  0x4d   :  { %731 = vmatprep.subr.bf16.mxu1 %v730_v54 }
  0x4f   :  { %701 = vmatpush3.bf16.msra.mxu0 %v700_v60 }
  0x50   :  { %733 = vmatpush3.bf16.msra.mxu1 %v732_v61  ;;  %703 = vmatprep.subr.bf16.mxu0 %v702_v62 }
  0x51   :  { %735 = vmatprep.subr.bf16.mxu1 %v734_v1 }
  0x53   :  { %705 = vmatpush3.bf16.msra.mxu0 %v704_v4 }
  0x54   :  { %737 = vmatpush3.bf16.msra.mxu1 %v736_v5 }
  0x56   :  { %369 = vmatmul.mubr.f32.vlgmr.msra.gmra.mrb[2].mxu0 %v32_v6 }
  0x57   :  { %439 = vmatmul.mubr.f32.vlgmr.msra.gmra.mrb[2].mxu1 %v34_v7 }
 0x109   :  { %v502_v8 = vpop.f32.mrb[0].mxu0 }
 0x10a   :  { %v537_v9 = vpop.f32.mrb[0].mxu1  ;;  %v503_v10 = vpop.f32.mrb[1].mxu0 }
 0x10b   :  { %v504_v11 = vadd.f32 %v503_v10, %v502_v8  ;;  %v538_v12 = vpop.f32.mrb[1].mxu1 }
 0x10c   :  { %v539_v13 = vadd.f32 %v538_v12, %v537_v9 }
 0x10e   :  { %v301_v14 = vadd.f32 %v539_v13, %v504_v11 }
 0x129   :  { %v572_v15 = vpop.f32.mrb[2].mxu0 }
 0x12a   :  { %v573_v16 = vpop.f32.mrb[3].mxu0  ;;  %v607_v17 = vpop.f32.mrb[2].mxu1 }
 0x12b   :  { %v574_v18 = vadd.f32 %v573_v16, %v572_v15  ;;  %v608_v19 = vpop.f32.mrb[3].mxu1 }
 0x12c   :  { %v609_v20 = vadd.f32 %v608_v19, %v607_v17 }
 0x12d   :  { %v371_v21 = vadd.f32 %v574_v18, %v301_v14 }
 0x12f   :  { %v441_v23 = vadd.f32 %v609_v20, %v371_v21 }
 0x131   :  { %v455_v24 = vadd.f32 %v469_v22, %v441_v23 }
 0x133   :  { %456 = vst [vmem:[%s833_s3] sm:$0xff] %v455_v24 }
 0x134   :  { %468 = vsyncpa [#allocation3], 1 }

</bundles_post_ra>
